<compile_context>
chip_gen: v7x
topology: tpu7x:2x2x1
jax: 0.10.0
libtpu: 0.0.40
codegen_flags: <defaults>
</compile_context>

<pallas_src>
import functools
import math

import jax
import jax.numpy as jnp
from jax import lax
from jax.experimental import pallas as pl
from jax.experimental.pallas import tpu as pltpu


# --------------------------------------------------------------------------- helpers
def _pick_row_tile(rows, cap=512):
    """Largest 8-multiple tile <= cap that divides `rows`, preferring >= 4 grid steps
    (>= 2 per TensorCore on v7x where the parallel axis is sharded across 2 TCs),
    falling back to >= 2 steps, then to a single full-rows block (always legal)."""
    cands = [t for t in (512, 256, 128, 64, 32, 16, 8) if t <= cap]
    for min_steps in (4, 2):
        for tm in cands:
            if rows % tm == 0 and rows // tm >= min_steps:
                return tm
    return rows


def _vmem_limit(tile_bytes):
    # Enough for double-buffered activation tiles + resident weights + compiler scratch,
    # capped at 48 MiB (~0.75x of v7x's 64 MiB physical VMEM). No artificial 32 MiB floor.
    return int(min(48 * 2**20, max(4 * tile_bytes, 16 * 2**20)))


def _erf(x):
    # Abramowitz & Stegun 7.1.26 rational approximation (max abs err ~1.5e-7).
    # VPU ops + one EUP exp; matches torch.erf far below the test tolerance.
    ax = jnp.abs(x)
    t = 1.0 / (1.0 + 0.3275911 * ax)
    poly = t * (0.254829592
                + t * (-0.284496736
                       + t * (1.421413741
                              + t * (-1.453152027 + t * 1.061405429))))
    e = 1.0 - poly * jnp.exp(-ax * ax)
    return jnp.where(x < 0.0, -e, e)


def _layernorm(x_f32, gamma, beta, eps):
    # TF-style LayerNorm (epsilon inside the sqrt), f32 math, EUP rsqrt.
    u = jnp.mean(x_f32, axis=-1, keepdims=True)
    d = x_f32 - u
    var = jnp.mean(d * d, axis=-1, keepdims=True)
    return gamma * (d * lax.rsqrt(var + eps)) + beta


# --------------------------------------------------------------------------- kernel 1: fused attention block
def _attention_block_kernel(*refs, num_heads, scale, eps, add_pos):
    if add_pos:
        (x_ref, pos_ref, mask_ref, w_qkv_ref, b_qkv_ref,
         w_ao_ref, p_ao_ref, o_ref) = refs
    else:
        (x_ref, mask_ref, w_qkv_ref, b_qkv_ref,
         w_ao_ref, p_ao_ref, o_ref) = refs
        pos_ref = None

    x = x_ref[...]                                        # [S, H] one batch
    if add_pos:
        x = x + pos_ref[...].astype(x.dtype)              # fused position-embedding add
    dtype = x.dtype
    x_f32 = x.astype(jnp.float32)                         # residual (dropout = identity)

    hidden = o_ref.shape[-1]
    hd = hidden // num_heads

    # fused Q/K/V projection; w_qkv is PyTorch-layout [3H, H] -> contract last dims
    qkv = lax.dot_general(x, w_qkv_ref[...],
                          dimension_numbers=(((1,), (1,)), ((), ())),
                          preferred_element_type=jnp.float32)
    qkv = (qkv + b_qkv_ref[...].astype(jnp.float32)).astype(dtype)   # [S, 3H]

    mask = mask_ref[...].astype(jnp.float32)              # [1, S] additive over key positions

    # per-head attention, all heads of this batch stay in VMEM (no HBM head-major layout)
    ctx_heads = []
    for h in range(num_heads):
        qh = qkv[:, h * hd:(h + 1) * hd]
        kh = qkv[:, hidden + h * hd: hidden + (h + 1) * hd]
        vh = qkv[:, 2 * hidden + h * hd: 2 * hidden + (h + 1) * hd]
        s = lax.dot_general(qh, kh,
                            dimension_numbers=(((1,), (1,)), ((), ())),
                            preferred_element_type=jnp.float32) * scale
        s = s + mask                                       # broadcasts over query rows
        s = s - jnp.max(s, axis=-1, keepdims=True)
        p = jnp.exp(s)
        p = p * pl.reciprocal(jnp.sum(p, axis=-1, keepdims=True))
        # cast probs back to the operand dtype so the PV matmul runs single-pass on the MXU
        ctx_heads.append(jnp.dot(p.astype(dtype), vh,
                                 preferred_element_type=jnp.float32))
    ctx = jnp.concatenate(ctx_heads, axis=-1).astype(dtype)          # [S, H] combined heads

    # attention output projection + residual + LayerNorm (fused epilogue)
    y = lax.dot_general(ctx, w_ao_ref[...],
                        dimension_numbers=(((1,), (1,)), ((), ())),
                        preferred_element_type=jnp.float32)
    prm = p_ao_ref[...].astype(jnp.float32)                # [3, H] = (bias, gamma, beta)
    xr = y + prm[0:1, :] + x_f32
    o_ref[...] = _layernorm(xr, prm[1:2, :], prm[2:3, :], eps).astype(o_ref.dtype)


def attention_block(x, attention_mask, pos_slice, params, *, num_heads, eps, add_pos):
    b, s, h = x.shape
    hd = h // num_heads
    scale = 1.0 / math.sqrt(hd)
    w_qkv = params["w_qkv"]
    b_qkv = params["b_qkv"].reshape(1, -1)
    w_ao = params["w_attn_out"]
    p_ao = params["p_attn_out"]

    itemsize = x.dtype.itemsize
    wbytes = (w_qkv.size + b_qkv.size + w_ao.size + p_ao.size) * w_qkv.dtype.itemsize
    # 2x in/out double-buffered tiles + 2x resident weights + in-kernel f32 temporaries
    tile_bytes = 4 * s * h * itemsize + 2 * wbytes + 4 * s * (3 * h + 2 * h) * 4 \
        + (s * h * itemsize if add_pos else 0)

    flops_per_b = (2 * s * h * 3 * h            # QKV
                   + num_heads * 4 * s * s * hd  # scores + PV
                   + 2 * s * h * h               # output projection
                   + 16 * s * h)                 # softmax / LN elementwise
    cost = pl.CostEstimate(
        flops=b * flops_per_b,
        transcendentals=b * (num_heads * s * s + s),
        bytes_accessed=(2 * b * s * h + b * s) * itemsize + wbytes
                       + (s * h * itemsize if add_pos else 0))

    kernel = functools.partial(_attention_block_kernel, num_heads=num_heads,
                               scale=scale, eps=eps, add_pos=add_pos)

    in_specs = [pl.BlockSpec((None, s, h), lambda i: (i, 0, 0))]
    operands = [x]
    if add_pos:
        in_specs.append(pl.BlockSpec((s, h), lambda i: (0, 0)))
        operands.append(pos_slice)
    in_specs += [
        pl.BlockSpec((None, None, 1, s), lambda i: (i, 0, 0, 0)),   # additive mask
        pl.BlockSpec(w_qkv.shape, lambda i: (0, 0)),                # resident [3H, H]
        pl.BlockSpec(b_qkv.shape, lambda i: (0, 0)),                # resident [1, 3H]
        pl.BlockSpec(w_ao.shape, lambda i: (0, 0)),                 # resident [H, H]
        pl.BlockSpec(p_ao.shape, lambda i: (0, 0)),                 # packed (bias, gamma, beta)
    ]
    operands += [attention_mask, w_qkv, b_qkv, w_ao, p_ao]

    return pl.pallas_call(
        kernel,
        out_shape=jax.ShapeDtypeStruct((b, s, h), x.dtype),
        grid=(b,),
        in_specs=in_specs,
        out_specs=pl.BlockSpec((None, s, h), lambda i: (i, 0, 0)),
        compiler_params=pltpu.CompilerParams(
            dimension_semantics=("parallel",),
            vmem_limit_bytes=_vmem_limit(tile_bytes)),
        cost_estimate=cost,
    )(*operands)


# --------------------------------------------------------------------------- kernel 2: fused FFN block
def _ffn_kernel(x_ref, w_in_ref, b_in_ref, w_out_ref, p_out_ref, o_ref, *, eps):
    x = x_ref[...]                                         # [TM, H]
    dtype = x.dtype
    x_f32 = x.astype(jnp.float32)                          # residual (dropout = identity)

    # intermediate dense + exact-erf GELU; [TM, I] activation stays in VMEM/vregs
    mid = lax.dot_general(x, w_in_ref[...],
                          dimension_numbers=(((1,), (1,)), ((), ())),
                          preferred_element_type=jnp.float32)
    mid = mid + b_in_ref[...].astype(jnp.float32)
    mid = 0.5 * mid * (1.0 + _erf(mid * (1.0 / math.sqrt(2.0))))

    # output dense + residual + LayerNorm
    y = lax.dot_general(mid.astype(dtype), w_out_ref[...],
                        dimension_numbers=(((1,), (1,)), ((), ())),
                        preferred_element_type=jnp.float32)
    prm = p_out_ref[...].astype(jnp.float32)               # [3, H] = (bias, gamma, beta)
    xr = y + prm[0:1, :] + x_f32
    o_ref[...] = _layernorm(xr, prm[1:2, :], prm[2:3, :], eps).astype(o_ref.dtype)


def ffn_block(x2, params, *, eps):
    rows, h = x2.shape
    w_in = params["w_inter"]
    b_in = params["b_inter"].reshape(1, -1)
    w_out = params["w_ffn_out"]
    p_out = params["p_ffn_out"]
    inter = w_in.shape[0]

    tm = _pick_row_tile(rows)
    itemsize = x2.dtype.itemsize
    wbytes = (w_in.size + b_in.size + w_out.size + p_out.size) * w_in.dtype.itemsize
    tile_bytes = 4 * tm * h * itemsize + 2 * wbytes + 4 * tm * inter * 4

    cost = pl.CostEstimate(
        flops=4 * rows * h * inter + 24 * rows * inter,
        transcendentals=rows * inter + rows,
        bytes_accessed=2 * rows * h * itemsize + wbytes)

    return pl.pallas_call(
        functools.partial(_ffn_kernel, eps=eps),
        out_shape=jax.ShapeDtypeStruct((rows, h), x2.dtype),
        grid=(pl.cdiv(rows, tm),),
        in_specs=[
            pl.BlockSpec((tm, h), lambda i: (i, 0)),        # row-tiled activations (+residual)
            pl.BlockSpec(w_in.shape, lambda i: (0, 0)),     # resident [I, H]
            pl.BlockSpec(b_in.shape, lambda i: (0, 0)),     # resident [1, I]
            pl.BlockSpec(w_out.shape, lambda i: (0, 0)),    # resident [H, I]
            pl.BlockSpec(p_out.shape, lambda i: (0, 0)),    # packed (bias, gamma, beta)
        ],
        out_specs=pl.BlockSpec((tm, h), lambda i: (i, 0)),
        compiler_params=pltpu.CompilerParams(
            dimension_semantics=("parallel",),
            vmem_limit_bytes=_vmem_limit(tile_bytes)),
        cost_estimate=cost,
    )(x2, w_in, b_in, w_out, p_out)


# --------------------------------------------------------------------------- module composition
def transformer_layer(x, attention_mask, pos_slice, params, *, num_heads, eps, add_pos):
    b, s, h = x.shape
    attn_out = attention_block(x, attention_mask, pos_slice, params,
                               num_heads=num_heads, eps=eps, add_pos=add_pos)
    out2 = ffn_block(attn_out.reshape(b * s, h), params, eps=eps)   # free reshape (contiguous)
    return out2.reshape(b, s, h)


def meld_trans_encoder(feature_input, attention_mask, pos_table, layer_params,
                       *, num_heads, eps, output_all_encoded_layers=False):
    s = feature_input.shape[1]
    pos_slice = pos_table[:s]
    x = feature_input
    all_layers = []
    for li, p in enumerate(layer_params):
        # position embeddings are added once, fused into the first layer's attention kernel
        x = transformer_layer(x, attention_mask, pos_slice, p,
                              num_heads=num_heads, eps=eps, add_pos=(li == 0))
        if output_all_encoded_layers:
            all_layers.append(x)
    if not output_all_encoded_layers:
        all_layers.append(x)
    return all_layers[-1]


# --------------------------------------------------------------------------- pure-JAX reference
def encoder_ref(feature, mask, pos_table, layer_params, *, num_heads, eps):
    b, s, h = feature.shape
    d = h // num_heads
    x = feature + pos_table[:s][None, :, :]

    def res_norm_ref(hh, res, w, packed):
        bias, gamma, beta = packed[0], packed[1], packed[2]
        y = jnp.einsum("bsi,oi->bso", hh, w) + bias
        xx = y + res
        u = jnp.mean(xx, axis=-1, keepdims=True)
        var = jnp.mean((xx - u) ** 2, axis=-1, keepdims=True)
        return gamma * ((xx - u) / jnp.sqrt(var + eps)) + beta

    for p in layer_params:
        wq, wk, wv = jnp.split(p["w_qkv"], 3, axis=0)
        bq, bk, bv = jnp.split(p["b_qkv"], 3, axis=0)

        def proj(w, bb):
            y = jnp.einsum("bsh,oh->bso", x, w) + bb
            return y.reshape(b, s, num_heads, d).transpose(0, 2, 1, 3)

        q, k, v = proj(wq, bq), proj(wk, bk), proj(wv, bv)
        scores = jnp.einsum("bhqd,bhkd->bhqk", q, k) / math.sqrt(d) + mask
        probs = jax.nn.softmax(scores, axis=-1)
        ctx = jnp.einsum("bhqk,bhkd->bhqd", probs, v).transpose(0, 2, 1, 3).reshape(b, s, h)

        attn_out = res_norm_ref(ctx, x, p["w_attn_out"], p["p_attn_out"])
        inter = jnp.einsum("bsh,oh->bso", attn_out, p["w_inter"]) + p["b_inter"]
        inter = inter * 0.5 * (1.0 + jax.scipy.special.erf(inter / math.sqrt(2.0)))
        x = res_norm_ref(inter, attn_out, p["w_ffn_out"], p["p_ffn_out"])
    return x


# --------------------------------------------------------------------------- demo
if __name__ == "__main__":
    B, S, H = 2, 8, 32
    NUM_HEADS = 4
    INTERMEDIATE = 64
    LAYER_NUM = 2
    MAX_LENS = 16
    EPS = 1e-12

    key = jax.random.PRNGKey(0)
    k_feat, k_pos, k_layers = jax.random.split(key, 3)

    feature = jax.random.normal(k_feat, (B, S, H), dtype=jnp.float32)
    pos_table = 0.02 * jax.random.normal(k_pos, (MAX_LENS, H), dtype=jnp.float32)

    # additive attention mask (0 = attend); mask out the last key position of batch 1
    attention_mask = jnp.zeros((B, 1, 1, S), dtype=jnp.float32)
    attention_mask = attention_mask.at[1, 0, 0, S - 1].set(-10000.0)

    def linear_init(k, dout, din):
        kw, kb = jax.random.split(k)
        bound = 1.0 / math.sqrt(din)
        w = jax.random.uniform(kw, (dout, din), minval=-bound, maxval=bound, dtype=jnp.float32)
        bb = jax.random.uniform(kb, (dout,), minval=-bound, maxval=bound, dtype=jnp.float32)
        return w, bb

    def init_layer(k):
        ks = jax.random.split(k, 6)
        wq, bq = linear_init(ks[0], H, H)
        wk, bk = linear_init(ks[1], H, H)
        wv, bv = linear_init(ks[2], H, H)
        w_ao, b_ao = linear_init(ks[3], H, H)
        w_in, b_in = linear_init(ks[4], INTERMEDIATE, H)
        w_fo, b_fo = linear_init(ks[5], H, INTERMEDIATE)
        ones = jnp.ones((H,), dtype=jnp.float32)
        zeros = jnp.zeros((H,), dtype=jnp.float32)
        return {
            "w_qkv": jnp.concatenate([wq, wk, wv], axis=0),
            "b_qkv": jnp.concatenate([bq, bk, bv], axis=0),
            "w_attn_out": w_ao, "p_attn_out": jnp.stack([b_ao, ones, zeros]),
            "w_inter": w_in, "b_inter": b_in,
            "w_ffn_out": w_fo, "p_ffn_out": jnp.stack([b_fo, ones, zeros]),
        }

    layer_params = [init_layer(k) for k in jax.random.split(k_layers, LAYER_NUM)]

    out = meld_trans_encoder(feature, attention_mask, pos_table, layer_params,
                             num_heads=NUM_HEADS, eps=EPS)
    out = jax.block_until_ready(out)

    ref = encoder_ref(feature, attention_mask, pos_table, layer_params,
                      num_heads=NUM_HEADS, eps=EPS)
    assert out.shape == (B, S, H)
    max_err = float(jnp.max(jnp.abs(out - ref)))
    assert jnp.allclose(out, ref, atol=1e-4, rtol=1e-4), f"mismatch vs reference, max err {max_err}"
    print("KERNEL_OK")
</pallas_src>

<mosaic_0001>
module attributes {stable_mosaic.version = 11 : i64} {
  func.func @_attention_block_kernel(%arg0: i32, %arg1: memref<1x8x32xf32, #tpu.memory_space<vmem>>, %arg2: memref<8x32xf32, #tpu.memory_space<vmem>>, %arg3: memref<1x1x1x8xf32, #tpu.memory_space<vmem>>, %arg4: memref<96x32xf32, #tpu.memory_space<vmem>>, %arg5: memref<1x96xf32, #tpu.memory_space<vmem>>, %arg6: memref<32x32xf32, #tpu.memory_space<vmem>>, %arg7: memref<3x32xf32, #tpu.memory_space<vmem>>, %arg8: memref<1x8x32xf32, #tpu.memory_space<vmem>>) attributes {dimension_semantics = [#tpu.dimension_semantics<parallel>], iteration_bounds = array<i64: 2>, scalar_prefetch = 0 : i64, scratch_operands = 0 : i64, tpu.core_type = #tpu.core_type<tc>, window_params = [{transform_indices = @transform_0, window_bounds = array<i64: 1, 8, 32>}, {pipeline_mode = #tpu.pipeline_mode<synchronous>, transform_indices = @transform_1, window_bounds = array<i64: 8, 32>}, {transform_indices = @transform_2, window_bounds = array<i64: 1, 1, 1, 8>}, {pipeline_mode = #tpu.pipeline_mode<synchronous>, transform_indices = @transform_3, window_bounds = array<i64: 96, 32>}, {pipeline_mode = #tpu.pipeline_mode<synchronous>, transform_indices = @transform_4, window_bounds = array<i64: 1, 96>}, {pipeline_mode = #tpu.pipeline_mode<synchronous>, transform_indices = @transform_5, window_bounds = array<i64: 32, 32>}, {pipeline_mode = #tpu.pipeline_mode<synchronous>, transform_indices = @transform_6, window_bounds = array<i64: 3, 32>}, {transform_indices = @transform_7, window_bounds = array<i64: 1, 8, 32>}]} {
    %c0 = arith.constant 0 : index
    %c0_0 = arith.constant 0 : index
    %c0_1 = arith.constant 0 : index
    %0 = vector.load %arg1[%c0, %c0_0, %c0_1] : memref<1x8x32xf32, #tpu.memory_space<vmem>>, vector<1x8x32xf32>
    %1 = vector.shape_cast %0 : vector<1x8x32xf32> to vector<8x32xf32>
    %c0_2 = arith.constant 0 : index
    %c0_3 = arith.constant 0 : index
    %2 = vector.load %arg2[%c0_2, %c0_3] : memref<8x32xf32, #tpu.memory_space<vmem>>, vector<8x32xf32>
    %3 = arith.addf %1, %2 : vector<8x32xf32>
    %c0_4 = arith.constant 0 : index
    %c0_5 = arith.constant 0 : index
    %4 = vector.load %arg4[%c0_4, %c0_5] : memref<96x32xf32, #tpu.memory_space<vmem>>, vector<96x32xf32>
    %cst = arith.constant dense<0.000000e+00> : vector<8x96xf32>
    %5 = tpu.matmul %3, %4, %cst {dimension_numbers = #tpu.dot_dimension_numbers<[1], [1], [0], [0], [0, 0, 1, 0], [], []>} : vector<8x32xf32>, vector<96x32xf32>, vector<8x96xf32> -> vector<8x96xf32>
    %c0_6 = arith.constant 0 : index
    %c0_7 = arith.constant 0 : index
    %6 = vector.load %arg5[%c0_6, %c0_7] : memref<1x96xf32, #tpu.memory_space<vmem>>, vector<1x96xf32>
    %7 = vector.broadcast %6 : vector<1x96xf32> to vector<8x96xf32>
    %8 = arith.addf %5, %7 : vector<8x96xf32>
    %c0_8 = arith.constant 0 : index
    %c0_9 = arith.constant 0 : index
    %c0_10 = arith.constant 0 : index
    %c0_11 = arith.constant 0 : index
    %9 = vector.load %arg3[%c0_8, %c0_9, %c0_10, %c0_11] : memref<1x1x1x8xf32, #tpu.memory_space<vmem>>, vector<1x1x1x8xf32>
    %10 = vector.shape_cast %9 : vector<1x1x1x8xf32> to vector<1x8xf32>
    %11 = vector.extract_strided_slice %8 {offsets = [0, 0], sizes = [8, 8], strides = [1, 1]} : vector<8x96xf32> to vector<8x8xf32>
    %12 = vector.extract_strided_slice %8 {offsets = [0, 32], sizes = [8, 8], strides = [1, 1]} : vector<8x96xf32> to vector<8x8xf32>
    %13 = vector.extract_strided_slice %8 {offsets = [0, 64], sizes = [8, 8], strides = [1, 1]} : vector<8x96xf32> to vector<8x8xf32>
    %cst_12 = arith.constant dense<0.000000e+00> : vector<8x8xf32>
    %14 = tpu.matmul %11, %12, %cst_12 {dimension_numbers = #tpu.dot_dimension_numbers<[1], [1], [0], [0], [0, 0, 1, 0], [], []>} : vector<8x8xf32>, vector<8x8xf32>, vector<8x8xf32> -> vector<8x8xf32>
    %cst_13 = arith.constant 0.353553385 : f32
    %15 = vector.broadcast %cst_13 : f32 to vector<8x8xf32>
    %16 = arith.mulf %14, %15 : vector<8x8xf32>
    %17 = vector.broadcast %10 : vector<1x8xf32> to vector<8x8xf32>
    %18 = arith.addf %16, %17 : vector<8x8xf32>
    %cst_14 = arith.constant dense<0xFF800000> : vector<8xf32>
    %19 = vector.multi_reduction <maximumf>, %18, %cst_14 [1] : vector<8x8xf32> to vector<8xf32>
    %20 = vector.shape_cast %19 : vector<8xf32> to vector<8x1xf32>
    %21 = vector.broadcast %20 : vector<8x1xf32> to vector<8x8xf32>
    %22 = arith.subf %18, %21 : vector<8x8xf32>
    %23 = math.exp %22 : vector<8x8xf32>
    %cst_15 = arith.constant dense<0.000000e+00> : vector<8xf32>
    %24 = vector.multi_reduction <add>, %23, %cst_15 [1] : vector<8x8xf32> to vector<8xf32>
    %25 = vector.shape_cast %24 : vector<8xf32> to vector<8x1xf32>
    %26 = tpu.reciprocal %25 : vector<8x1xf32> -> vector<8x1xf32>
    %27 = vector.broadcast %26 : vector<8x1xf32> to vector<8x8xf32>
    %28 = arith.mulf %23, %27 : vector<8x8xf32>
    %cst_16 = arith.constant dense<0.000000e+00> : vector<8x8xf32>
    %29 = tpu.matmul %28, %13, %cst_16 {dimension_numbers = #tpu.dot_dimension_numbers<[1], [0], [0], [1], [0, 0, 1, 1], [], []>} : vector<8x8xf32>, vector<8x8xf32>, vector<8x8xf32> -> vector<8x8xf32>
    %30 = vector.extract_strided_slice %8 {offsets = [0, 8], sizes = [8, 8], strides = [1, 1]} : vector<8x96xf32> to vector<8x8xf32>
    %31 = vector.extract_strided_slice %8 {offsets = [0, 40], sizes = [8, 8], strides = [1, 1]} : vector<8x96xf32> to vector<8x8xf32>
    %32 = vector.extract_strided_slice %8 {offsets = [0, 72], sizes = [8, 8], strides = [1, 1]} : vector<8x96xf32> to vector<8x8xf32>
    %cst_17 = arith.constant dense<0.000000e+00> : vector<8x8xf32>
    %33 = tpu.matmul %30, %31, %cst_17 {dimension_numbers = #tpu.dot_dimension_numbers<[1], [1], [0], [0], [0, 0, 1, 0], [], []>} : vector<8x8xf32>, vector<8x8xf32>, vector<8x8xf32> -> vector<8x8xf32>
    %cst_18 = arith.constant 0.353553385 : f32
    %34 = vector.broadcast %cst_18 : f32 to vector<8x8xf32>
    %35 = arith.mulf %33, %34 : vector<8x8xf32>
    %36 = vector.broadcast %10 : vector<1x8xf32> to vector<8x8xf32>
    %37 = arith.addf %35, %36 : vector<8x8xf32>
    %cst_19 = arith.constant dense<0xFF800000> : vector<8xf32>
    %38 = vector.multi_reduction <maximumf>, %37, %cst_19 [1] : vector<8x8xf32> to vector<8xf32>
    %39 = vector.shape_cast %38 : vector<8xf32> to vector<8x1xf32>
    %40 = vector.broadcast %39 : vector<8x1xf32> to vector<8x8xf32>
    %41 = arith.subf %37, %40 : vector<8x8xf32>
    %42 = math.exp %41 : vector<8x8xf32>
    %cst_20 = arith.constant dense<0.000000e+00> : vector<8xf32>
    %43 = vector.multi_reduction <add>, %42, %cst_20 [1] : vector<8x8xf32> to vector<8xf32>
    %44 = vector.shape_cast %43 : vector<8xf32> to vector<8x1xf32>
    %45 = tpu.reciprocal %44 : vector<8x1xf32> -> vector<8x1xf32>
    %46 = vector.broadcast %45 : vector<8x1xf32> to vector<8x8xf32>
    %47 = arith.mulf %42, %46 : vector<8x8xf32>
    %cst_21 = arith.constant dense<0.000000e+00> : vector<8x8xf32>
    %48 = tpu.matmul %47, %32, %cst_21 {dimension_numbers = #tpu.dot_dimension_numbers<[1], [0], [0], [1], [0, 0, 1, 1], [], []>} : vector<8x8xf32>, vector<8x8xf32>, vector<8x8xf32> -> vector<8x8xf32>
    %49 = vector.extract_strided_slice %8 {offsets = [0, 16], sizes = [8, 8], strides = [1, 1]} : vector<8x96xf32> to vector<8x8xf32>
    %50 = vector.extract_strided_slice %8 {offsets = [0, 48], sizes = [8, 8], strides = [1, 1]} : vector<8x96xf32> to vector<8x8xf32>
    %51 = vector.extract_strided_slice %8 {offsets = [0, 80], sizes = [8, 8], strides = [1, 1]} : vector<8x96xf32> to vector<8x8xf32>
    %cst_22 = arith.constant dense<0.000000e+00> : vector<8x8xf32>
    %52 = tpu.matmul %49, %50, %cst_22 {dimension_numbers = #tpu.dot_dimension_numbers<[1], [1], [0], [0], [0, 0, 1, 0], [], []>} : vector<8x8xf32>, vector<8x8xf32>, vector<8x8xf32> -> vector<8x8xf32>
    %cst_23 = arith.constant 0.353553385 : f32
    %53 = vector.broadcast %cst_23 : f32 to vector<8x8xf32>
    %54 = arith.mulf %52, %53 : vector<8x8xf32>
    %55 = vector.broadcast %10 : vector<1x8xf32> to vector<8x8xf32>
    %56 = arith.addf %54, %55 : vector<8x8xf32>
    %cst_24 = arith.constant dense<0xFF800000> : vector<8xf32>
    %57 = vector.multi_reduction <maximumf>, %56, %cst_24 [1] : vector<8x8xf32> to vector<8xf32>
    %58 = vector.shape_cast %57 : vector<8xf32> to vector<8x1xf32>
    %59 = vector.broadcast %58 : vector<8x1xf32> to vector<8x8xf32>
    %60 = arith.subf %56, %59 : vector<8x8xf32>
    %61 = math.exp %60 : vector<8x8xf32>
    %cst_25 = arith.constant dense<0.000000e+00> : vector<8xf32>
    %62 = vector.multi_reduction <add>, %61, %cst_25 [1] : vector<8x8xf32> to vector<8xf32>
    %63 = vector.shape_cast %62 : vector<8xf32> to vector<8x1xf32>
    %64 = tpu.reciprocal %63 : vector<8x1xf32> -> vector<8x1xf32>
    %65 = vector.broadcast %64 : vector<8x1xf32> to vector<8x8xf32>
    %66 = arith.mulf %61, %65 : vector<8x8xf32>
    %cst_26 = arith.constant dense<0.000000e+00> : vector<8x8xf32>
    %67 = tpu.matmul %66, %51, %cst_26 {dimension_numbers = #tpu.dot_dimension_numbers<[1], [0], [0], [1], [0, 0, 1, 1], [], []>} : vector<8x8xf32>, vector<8x8xf32>, vector<8x8xf32> -> vector<8x8xf32>
    %68 = vector.extract_strided_slice %8 {offsets = [0, 24], sizes = [8, 8], strides = [1, 1]} : vector<8x96xf32> to vector<8x8xf32>
    %69 = vector.extract_strided_slice %8 {offsets = [0, 56], sizes = [8, 8], strides = [1, 1]} : vector<8x96xf32> to vector<8x8xf32>
    %70 = vector.extract_strided_slice %8 {offsets = [0, 88], sizes = [8, 8], strides = [1, 1]} : vector<8x96xf32> to vector<8x8xf32>
    %cst_27 = arith.constant dense<0.000000e+00> : vector<8x8xf32>
    %71 = tpu.matmul %68, %69, %cst_27 {dimension_numbers = #tpu.dot_dimension_numbers<[1], [1], [0], [0], [0, 0, 1, 0], [], []>} : vector<8x8xf32>, vector<8x8xf32>, vector<8x8xf32> -> vector<8x8xf32>
    %cst_28 = arith.constant 0.353553385 : f32
    %72 = vector.broadcast %cst_28 : f32 to vector<8x8xf32>
    %73 = arith.mulf %71, %72 : vector<8x8xf32>
    %74 = vector.broadcast %10 : vector<1x8xf32> to vector<8x8xf32>
    %75 = arith.addf %73, %74 : vector<8x8xf32>
    %cst_29 = arith.constant dense<0xFF800000> : vector<8xf32>
    %76 = vector.multi_reduction <maximumf>, %75, %cst_29 [1] : vector<8x8xf32> to vector<8xf32>
    %77 = vector.shape_cast %76 : vector<8xf32> to vector<8x1xf32>
    %78 = vector.broadcast %77 : vector<8x1xf32> to vector<8x8xf32>
    %79 = arith.subf %75, %78 : vector<8x8xf32>
    %80 = math.exp %79 : vector<8x8xf32>
    %cst_30 = arith.constant dense<0.000000e+00> : vector<8xf32>
    %81 = vector.multi_reduction <add>, %80, %cst_30 [1] : vector<8x8xf32> to vector<8xf32>
    %82 = vector.shape_cast %81 : vector<8xf32> to vector<8x1xf32>
    %83 = tpu.reciprocal %82 : vector<8x1xf32> -> vector<8x1xf32>
    %84 = vector.broadcast %83 : vector<8x1xf32> to vector<8x8xf32>
    %85 = arith.mulf %80, %84 : vector<8x8xf32>
    %cst_31 = arith.constant dense<0.000000e+00> : vector<8x8xf32>
    %86 = tpu.matmul %85, %70, %cst_31 {dimension_numbers = #tpu.dot_dimension_numbers<[1], [0], [0], [1], [0, 0, 1, 1], [], []>} : vector<8x8xf32>, vector<8x8xf32>, vector<8x8xf32> -> vector<8x8xf32>
    %87 = tpu.concatenate %29, %48, %67, %86 in 1 : vector<8x8xf32>, vector<8x8xf32>, vector<8x8xf32>, vector<8x8xf32> -> vector<8x32xf32>
    %c0_32 = arith.constant 0 : index
    %c0_33 = arith.constant 0 : index
    %88 = vector.load %arg6[%c0_32, %c0_33] : memref<32x32xf32, #tpu.memory_space<vmem>>, vector<32x32xf32>
    %cst_34 = arith.constant dense<0.000000e+00> : vector<8x32xf32>
    %89 = tpu.matmul %87, %88, %cst_34 {dimension_numbers = #tpu.dot_dimension_numbers<[1], [1], [0], [0], [0, 0, 1, 0], [], []>} : vector<8x32xf32>, vector<32x32xf32>, vector<8x32xf32> -> vector<8x32xf32>
    %c0_35 = arith.constant 0 : index
    %c0_36 = arith.constant 0 : index
    %90 = vector.load %arg7[%c0_35, %c0_36] : memref<3x32xf32, #tpu.memory_space<vmem>>, vector<3x32xf32>
    %91 = vector.extract_strided_slice %90 {offsets = [0, 0], sizes = [1, 32], strides = [1, 1]} : vector<3x32xf32> to vector<1x32xf32>
    %92 = vector.broadcast %91 : vector<1x32xf32> to vector<8x32xf32>
    %93 = arith.addf %89, %92 : vector<8x32xf32>
    %94 = arith.addf %93, %3 : vector<8x32xf32>
    %95 = vector.extract_strided_slice %90 {offsets = [1, 0], sizes = [1, 32], strides = [1, 1]} : vector<3x32xf32> to vector<1x32xf32>
    %96 = vector.extract_strided_slice %90 {offsets = [2, 0], sizes = [1, 32], strides = [1, 1]} : vector<3x32xf32> to vector<1x32xf32>
    %cst_37 = arith.constant dense<0.000000e+00> : vector<8xf32>
    %97 = vector.multi_reduction <add>, %94, %cst_37 [1] : vector<8x32xf32> to vector<8xf32>
    %98 = vector.shape_cast %97 : vector<8xf32> to vector<8x1xf32>
    %cst_38 = arith.constant 3.200000e+01 : f32
    %99 = vector.broadcast %cst_38 : f32 to vector<8x1xf32>
    %100 = arith.divf %98, %99 : vector<8x1xf32>
    %101 = vector.broadcast %100 : vector<8x1xf32> to vector<8x32xf32>
    %102 = arith.subf %94, %101 : vector<8x32xf32>
    %103 = arith.mulf %102, %102 : vector<8x32xf32>
    %cst_39 = arith.constant dense<0.000000e+00> : vector<8xf32>
    %104 = vector.multi_reduction <add>, %103, %cst_39 [1] : vector<8x32xf32> to vector<8xf32>
    %105 = vector.shape_cast %104 : vector<8xf32> to vector<8x1xf32>
    %cst_40 = arith.constant 3.200000e+01 : f32
    %106 = vector.broadcast %cst_40 : f32 to vector<8x1xf32>
    %107 = arith.divf %105, %106 : vector<8x1xf32>
    %cst_41 = arith.constant 9.99999996E-13 : f32
    %108 = vector.broadcast %cst_41 : f32 to vector<8x1xf32>
    %109 = arith.addf %107, %108 : vector<8x1xf32>
    %110 = math.rsqrt %109 : vector<8x1xf32>
    %111 = vector.broadcast %110 : vector<8x1xf32> to vector<8x32xf32>
    %112 = arith.mulf %102, %111 : vector<8x32xf32>
    %113 = vector.broadcast %95 : vector<1x32xf32> to vector<8x32xf32>
    %114 = arith.mulf %113, %112 : vector<8x32xf32>
    %115 = vector.broadcast %96 : vector<1x32xf32> to vector<8x32xf32>
    %116 = arith.addf %114, %115 : vector<8x32xf32>
    %c0_42 = arith.constant 0 : index
    %c0_43 = arith.constant 0 : index
    %c0_44 = arith.constant 0 : index
    %117 = vector.load %arg8[%c0_42, %c0_43, %c0_44] : memref<1x8x32xf32, #tpu.memory_space<vmem>>, vector<1x8x32xf32>
    %118 = vector.shape_cast %117 : vector<1x8x32xf32> to vector<8x32xf32>
    %119 = vector.shape_cast %116 : vector<8x32xf32> to vector<1x8x32xf32>
    tpu.vector_store %arg8[%c0_42, %c0_43, %c0_44], %119 {strides = array<i32>} : memref<1x8x32xf32, #tpu.memory_space<vmem>>, vector<1x8x32xf32>,
    return
  }
  func.func @transform_0(%arg0: i32) -> (i32, i32, i32) {
    %c0_i32 = arith.constant 0 : i32
    %c0_i32_0 = arith.constant 0 : i32
    %c0_i32_1 = arith.constant 0 : i32
    return %arg0, %c0_i32, %c0_i32_0 : i32, i32, i32
  }
  func.func @transform_1(%arg0: i32) -> (i32, i32) {
    %c0_i32 = arith.constant 0 : i32
    %c0_i32_0 = arith.constant 0 : i32
    %c0_i32_1 = arith.constant 0 : i32
    return %c0_i32, %c0_i32_0 : i32, i32
  }
  func.func @transform_2(%arg0: i32) -> (i32, i32, i32, i32) {
    %c0_i32 = arith.constant 0 : i32
    %c0_i32_0 = arith.constant 0 : i32
    %c0_i32_1 = arith.constant 0 : i32
    %c0_i32_2 = arith.constant 0 : i32
    return %arg0, %c0_i32, %c0_i32_0, %c0_i32_1 : i32, i32, i32, i32
  }
  func.func @transform_3(%arg0: i32) -> (i32, i32) {
    %c0_i32 = arith.constant 0 : i32
    %c0_i32_0 = arith.constant 0 : i32
    %c0_i32_1 = arith.constant 0 : i32
    return %c0_i32, %c0_i32_0 : i32, i32
  }
  func.func @transform_4(%arg0: i32) -> (i32, i32) {
    %c0_i32 = arith.constant 0 : i32
    %c0_i32_0 = arith.constant 0 : i32
    %c0_i32_1 = arith.constant 0 : i32
    return %c0_i32, %c0_i32_0 : i32, i32
  }
  func.func @transform_5(%arg0: i32) -> (i32, i32) {
    %c0_i32 = arith.constant 0 : i32
    %c0_i32_0 = arith.constant 0 : i32
    %c0_i32_1 = arith.constant 0 : i32
    return %c0_i32, %c0_i32_0 : i32, i32
  }
  func.func @transform_6(%arg0: i32) -> (i32, i32) {
    %c0_i32 = arith.constant 0 : i32
    %c0_i32_0 = arith.constant 0 : i32
    %c0_i32_1 = arith.constant 0 : i32
    return %c0_i32, %c0_i32_0 : i32, i32
  }
  func.func @transform_7(%arg0: i32) -> (i32, i32, i32) {
    %c0_i32 = arith.constant 0 : i32
    %c0_i32_0 = arith.constant 0 : i32
    %c0_i32_1 = arith.constant 0 : i32
    return %arg0, %c0_i32, %c0_i32_0 : i32, i32, i32
  }
}

</mosaic_0001>

<bundles_post_ra>
// kernel: tpu_custom_call.1
= control target key start
LH: loop header
LB: loop body
LE: loop exit
PB: predicated region body
PF: predicated region fallthrough
CT: control target
= control target key end

     0   :  { %12 = vsyncpa [#allocation3], 0  ;;  %s1971_s0 = inlined_call_operand.vmem [shape: f32[2,8,32], index: 0, kind: input, shape index: {}]   ;;  %s1972_s1 = inlined_call_operand.vmem [shape: f32[8,32], index: 1, kind: input, shape index: {}]   ;;  %s1973_s2 = inlined_call_operand.vmem [shape: f32[2,1,1,8], index: 2, kind: input, shape index: {}]   ;;  %s1974_s3 = inlined_call_operand.vmem [shape: f32[96,32], index: 3, kind: input, shape index: {}]   ;;  %s1975_s4 = inlined_call_operand.vmem [shape: f32[1,96], index: 4, kind: input, shape index: {}]   ;;  %s1976_s5 = inlined_call_operand.vmem [shape: f32[32,32], index: 5, kind: input, shape index: {}]   ;;  %s1977_s6 = inlined_call_operand.vmem [shape: f32[3,32], index: 6, kind: input, shape index: {}]   ;;  %s1978_s7 = inlined_call_operand.hbm [shape: f32[2,8,32], index: 7, kind: output, shape index: {}]  }
   0x1   :  { %14 = vsyncpa [#allocation3 + $0x1], 0  ;;  %s1696_s24 = smov 0   ;;  %s1698_s25 = smov 0  }
   0x2   :  { %s1700_s26 = smov 0   ;;  %s1702_s27 = smov 0  }
   0x3 LB: > { %s1717_s28 = sadd.s32 4294967295, %s1636_s27   ;;  %s1314_s29 = sadd.s32 4294967294, %s1636_s27   ;;  %s1636_s27 = sphi %s1702_s27, %s1986_s27   ;;  %s1632_s26 = sphi %s1700_s26, %s1985_s26   ;;  %s1628_s25 = sphi %s1698_s25, %s1984_s25   ;;  %s1624_s24 = sphi %s1696_s24, %s1983_s24  }
   0x4   : > { %s1721_s30 = sadd.s32 1, %s1636_s27   ;;  %s184_s8 = sadd.s32 1, %s1632_s26 }
   0x5   : > { %s181_s9 = ssub.s32 %s1636_s27, %s1721_s30  ;;  %p194_p0 = scmp.ne.s32.totalorder %s1632_s26, %s1628_s25 }
   0x6   : > { %p182_p1 = scmp.eq.s32.totalorder %s181_s9, 0  ;;  %p195_p2 = scmp.eq.s32.totalorder %s1717_s28, 1 }
   0x7   : > { %p200_p3 = scmp.ne.s32.totalorder %s1628_s25, %s1624_s24  ;;  %p201_p4 = scmp.eq.s32.totalorder %s1314_s29, 1 }
   0x8   : > { %s1732_s10 = scalar_select %p182_p1, %s1632_s26, %s184_s8  }
   0x9   : > { %p1734_p5 = por %p195_p2, %p194_p0  ;;  %p1738_p6 = por %p201_p4, %p200_p3 }
   0xa   : > { %p1317_p7 = scmp.ge.s32.totalorder %s1636_s27, 1  ;;  %p247_p8 = scmp.lt.s32.totalorder %s1636_s27, 3 }
   0xc   : > { %p248_p9 = pnand %p1317_p7, %p247_p8 }
   0xd   : > { %v291_v0 = vld [vmem:[%s1974_s3] sm:$0xff] (!%p248_p9)  ;;  %v292_v1 = vld [vmem:[%s1974_s3 + $0x8] sm:$0xff] (!%p248_p9)  ;;  %vm310_vm0 = vcmask (!%p248_p9), 261120   ;;  %v1638_v2 = vmov (!%p248_p9), 0.0|0.0   ;;  %vm1639_vm2 = vmmov (!%p248_p9), 0   ;;  %v1640_v5 = vmov (!%p248_p9), 0.0  }
   0xe   : > { %251 = sbr.rel (%p248_p9) target bundleno = 3398 (0xd46), region = 48  ;;  %1468 = vmatprep.subr.bf16.mxu0 (!%p248_p9), %v1638_v2  ;;  %v1469_v3 = vpack.c.bf16 (!%p248_p9), %v292_v1, %v291_v0  ;;  %vm1753_vm1 = vmpackc.low (!%p248_p9), %vm310_vm0, %vm310_vm0  ;;  %1414 = vmatprep.mubr.msk.f32.mxu0 (!%p248_p9), %vm1639_vm2, %v1640_v5  ;;  %v293_v6 = vld [vmem:[%s1974_s3 + $0x10] sm:$0xff] (!%p248_p9)  ;;  %v294_v7 = vld [vmem:[%s1974_s3 + $0x18] sm:$0xff] (!%p248_p9)  ;;  %p281_p10 = scmp.lt.s32.totalorder (!%p248_p9), %s1717_s28, 1  ;;  %vm424_vm3 = vcmask (!%p248_p9), 64512   ;;  %vm1108_vm4 = vcmask (!%p248_p9), 130048  }
   0xf   : > { %1417 = vmatprep.subr.mxu1 (!%p248_p9), %v1640_v5  ;;  %1419 = vmatprep.mubr.msk.f32.mxu1 (!%p248_p9), %vm1639_vm2, %v1640_v5  ;;  %v1473_v8 = vpack.c.bf16 (!%p248_p9), %v294_v7, %v293_v6  ;;  %v295_v9 = vld [vmem:[%s1974_s3 + $0x20] sm:$0xff] (!%p248_p9)  ;;  %v296_v10 = vld [vmem:[%s1974_s3 + $0x28] sm:$0xff] (!%p248_p9)  ;;  %v297_v12 = vld [vmem:[%s1974_s3 + $0x30] sm:$0xff] (!%p248_p9)  ;;  %s1641_s18 = smov (!%p248_p9), 64   ;;  %s1642_s20 = smov (!%p248_p9), 96   ;;  %vm1110_vm5 = vcmask (!%p248_p9), 195584  }
  0x10   : > { %1471 = vmatpush3.bf16.xpose.msk.msra.mxu0 (!%p248_p9), %vm1753_vm1, %v1469_v3  ;;  %v1477_v11 = vpack.c.bf16 (!%p248_p9), %v296_v10, %v295_v9  ;;  %v298_v13 = vld [vmem:[%s1974_s3 + $0x38] sm:$0xff] (!%p248_p9)  ;;  %v299_v15 = vld [vmem:[%s1974_s3 + $0x40] sm:$0xff] (!%p248_p9)  ;;  %v300_v16 = vld [vmem:[%s1974_s3 + $0x48] sm:$0xff] (!%p248_p9)  ;;  %s1643_s21 = smov (!%p248_p9), 88   ;;  %s1644_s8 = smov (!%p248_p9), 56  }
  0x11   : > { %1472 = vmatprep.subr.bf16.mxu0 (!%p248_p9), %v1638_v2  ;;  %v1481_v14 = vpack.c.bf16 (!%p248_p9), %v298_v13, %v297_v12  ;;  %v1485_v17 = vpack.c.bf16 (!%p248_p9), %v300_v16, %v299_v15  ;;  %v301_v18 = vld [vmem:[%s1974_s3 + $0x50] sm:$0xff] (!%p248_p9)  ;;  %v302_v19 = vld [vmem:[%s1974_s3 + $0x58] sm:$0xff] (!%p248_p9)  ;;  %v289_v22 = vld [vmem:[%s1972_s1] sm:$0xff] (!%p248_p9)  ;;  %s1645_s9 = smov (!%p248_p9), 80   ;;  %s1648_s14 = smov (!%p248_p9), 48  }
  0x12   : > { %v1489_v20 = vpack.c.bf16 (!%p248_p9), %v302_v19, %v301_v18  ;;  %v1320_v24 = vld [vmem:[%s1975_s4] ss:$0 sm:$0xff] (!%p248_p9)  ;;  %s1649_s15 = smov (!%p248_p9), 72   ;;  %s1650_s16 = smov (!%p248_p9), 104  }
  0x13   : > { %s1651_s17 = smov (!%p248_p9), 40  }
  0x15   : > { %s1800_s19 = scalar_select %p281_p10, %s1717_s28, 1 }
  0x17   : > { %s1319_s29 = sshll.u32 %s1800_s19, 3 }
  0x18   : > { %1475 = vmatpush3.bf16.xpose.msk.msra.mxu0 %vm1753_vm1, %v1473_v8  ;;  %s284_s13 = scalar_lea.vmem %s1971_s0, %s1319_s29  ;;  %s287_s29 = scalar_lea.vmem %s1973_s2, %s1800_s19 }
  0x19   : > { %1476 = vmatprep.subr.bf16.mxu0 %v1638_v2  ;;  %v288_v21 = vld [vmem:[%s284_s13] sm:$0xff]  ;;  %s1646_s19 = smov 120   ;;  %s1647_s13 = smov 112  }
  0x1a   : > { %v1820_v23 = vadd.f32 %v289_v22, %v288_v21  ;;  %v1843_v31 = vld [vmem:[%s287_s29] ss:$0 sm:$0xff] }
  0x20   : > { %1479 = vmatpush3.bf16.xpose.msk.msra.mxu0 %vm1753_vm1, %v1477_v11 }
  0x21   : > { %1480 = vmatprep.subr.bf16.mxu0 %v1638_v2 }
  0x28   : > { %1483 = vmatpush3.bf16.xpose.msk.msra.mxu0 %vm1753_vm1, %v1481_v14 }
  0x29   : > { %1484 = vmatprep.subr.bf16.mxu0 %v1638_v2 }
  0x30   : > { %1487 = vmatpush3.bf16.xpose.msk.msra.mxu0 %vm1753_vm1, %v1485_v17 }
  0x31   : > { %1488 = vmatprep.subr.bf16.mxu0 %v1638_v2 }
  0x38   : > { %1491 = vmatpush3.bf16.xpose.msk.msra.mxu0 %vm1753_vm1, %v1489_v20 }
  0x3f   : > { %1415 = vmatmul.mubr.msk.f32.vlgmr.msra.gmra.mrb[0].mxu0 %vm310_vm0, %v1820_v23 }
 0x112   : > { %v416_v25 = vpop.f32.mrb[0].mxu0 }
 0x113   : > { %v1827_v26 = vadd.f32 %v1320_v24, %v416_v25  ;;  %v1416_v27 = vpop.f32.mrb[1].mxu0 }
 0x115   : > { %518 = vrot.lane.b32.xlu1 %v1827_v26, %s1641_s18  ;;  %422 = vrot.lane.b32.xlu0 %v1827_v26, %s1642_s20  ;;  %s1652_s18 = smov 8   ;;  %s1653_s20 = smov 16  }
 0x119   : > { %596 = vrot.lane.b32.xlu1 %v1827_v26, %s1643_s21 }
 0x187   : > { %v423_v28 = vpop.permute.xlu0 %422  ;;  %v519_v29 = vpop.permute.xlu1 %518 }
 0x188   : > { %1418 = vmatpush3.xpose.msk.msra.mxu1 %vm424_vm3, %v423_v28 }
 0x189   : > { %1422 = vmatprep.subr.mxu1 %v1640_v5 }
 0x18b   : > { %1420 = vmatmul.mubr.msk.f32.vlgmr.msra.gmra.mrb[0].mxu1 %vm424_vm3, %v1827_v26  ;;  %v597_v41 = vpop.permute.xlu1 %596 }
 0x18c   : > { %1423 = vmatpush3.msra.mxu1 %v519_v29  ;;  %1424 = vmatprep.mubr.msk.f32.mxu1 %vm1639_vm2, %v1640_v5 }
 0x18d   : > { %1427 = vmatprep.subr.mxu1 %v1640_v5 }
 0x25e   : > { %v495_v30 = vpop.f32.mrb[0].mxu1 }
 0x25f   : > { %v499_v32 = vmul.f32 0.35355338, %v495_v30  ;;  %v1421_v33 = vpop.f32.mrb[1].mxu1 }
 0x261   : > { %v506_v34 = vadd.f32 %v1843_v31, %v499_v32 }
 0x263   : > { %v507_v35 = vsel %vm424_vm3, %v506_v34, -inf }
 0x264   : > { %508 = vmax.xlane.f32.xlu0 %v507_v35 }
 0x27a   : > { %685 = vrot.lane.b32.xlu0 %v1827_v26, %s1644_s8 }
 0x27e   : > { %763 = vrot.lane.b32.xlu0 %v1827_v26, %s1645_s9 }
 0x2f1   : > { %v509_v36 = vpop.xlane.xlu0 %508 }
 0x2f2   : > { %v510_v37 = vsub.f32 %v506_v34, %v509_v36 }
 0x2f4   : > { %v511_v38 = vmul.f32 1.442695, %v510_v37 }
 0x2f5   : > { %v686_v46 = vpop.permute.xlu0 %685 }
 0x2f6   : > { %1556 = vpow2.f32 %v511_v38 }
 0x2f9   : > { %v764_v59 = vpop.permute.xlu0 %763 }
 0x300   : > { %v1557_v39 = vpop.eup %1556 }
 0x301   : > { %v513_v40 = vsel %vm424_vm3, %v1557_v39, 0.0 }
 0x302   : > { %514 = vadd.xlane.f32.xlu1 %v513_v40 }
 0x313   : > { %594 = vrot.lane.b32.xlu1 %v1827_v26, %s1646_s19 }
 0x38f   : > { %v515_v42 = vpop.xlane.xlu1 %514 }
 0x390   : > { %1558 = vrcp.f32 %v515_v42 }
 0x393   : > { %v595_v45 = vpop.permute.xlu1 %594 }
 0x39a   : > { %v1559_v43 = vpop.eup %1558 }
 0x39b   : > { %v517_v44 = vmul.f32 %v1559_v43, %v1557_v39  ;;  %v1113_v39 = vld [vmem:[%s1976_s5 + $0x8] sm:$0xff] }
 0x39d   : > { %1425 = vmatmul.mubr.msk.f32.vlgmr.msra.gmra.mrb[2].mxu1 %vm424_vm3, %v517_v44 }
 0x39e   : > { %1428 = vmatpush3.xpose.msk.msra.mxu1 %vm424_vm3, %v597_v41  ;;  %1429 = vmatprep.mubr.msk.f32.mxu1 %vm1639_vm2, %v1640_v5  ;;  %v1114_v41 = vld [vmem:[%s1976_s5 + $0x10] sm:$0xff] }
 0x39f   : > { %1432 = vmatprep.subr.mxu1 %v1640_v5 }
 0x3a1   : > { %1430 = vmatmul.mubr.msk.f32.vlgmr.msra.gmra.mrb[4].mxu1 %vm424_vm3, %v595_v45 }
 0x3a2   : > { %1433 = vmatpush3.msra.mxu1 %v686_v46  ;;  %1434 = vmatprep.mubr.msk.f32.mxu1 %vm1639_vm2, %v1640_v5 }
 0x3a3   : > { %1437 = vmatprep.subr.mxu1 %v1640_v5 }
 0x470   : > { %v1860_v47 = vpop.f32.mrb[2].mxu1 }
 0x471   : > { %v1426_v48 = vpop.f32.mrb[3].mxu1 }
 0x474   : > { %v668_v49 = vpop.f32.mrb[4].mxu1 }
 0x475   : > { %v672_v50 = vmul.f32 0.35355338, %v668_v49  ;;  %v1431_v51 = vpop.f32.mrb[5].mxu1 }
 0x476   : > { %v1117_v51 = vlaneseq }
 0x477   : > { %v673_v52 = vadd.f32 %v1843_v31, %v672_v50 }
 0x479   : > { %v674_v53 = vsel %vm424_vm3, %v673_v52, -inf }
 0x47a   : > { %675 = vmax.xlane.f32.xlu1 %v674_v53  ;;  %v1116_v53 = vld [vmem:[%s1977_s6] sm:$0x7] }
 0x507   : > { %v676_v54 = vpop.xlane.xlu1 %675 }
 0x508   : > { %v677_v55 = vsub.f32 %v673_v52, %v676_v54  ;;  %v1118_v52 = vshrl.u32 %v1117_v51, 7 }
 0x50a   : > { %v678_v56 = vmul.f32 1.442695, %v677_v55  ;;  %v1119_v4 = vsub.s32 0, %v1118_v52 }
 0x50c   : > { %1560 = vpow2.f32 %v678_v56  ;;  %v1120_v54 = vrot.slane %v1116_v53, %v1119_v4 }
 0x516   : > { %v1561_v57 = vpop.eup %1560 }
 0x517   : > { %v680_v58 = vsel %vm424_vm3, %v1561_v57, 0.0 }
 0x518   : > { %681 = vadd.xlane.f32.xlu0 %v680_v58 }
 0x52e   : > { %761 = vrot.lane.b32.xlu0 %v1827_v26, %s1647_s13 }
 0x5a5   : > { %v682_v60 = vpop.xlane.xlu0 %681 }
 0x5a6   : > { %1562 = vrcp.f32 %v682_v60 }
 0x5a9   : > { %v762_v63 = vpop.permute.xlu0 %761 }
 0x5b0   : > { %v1563_v61 = vpop.eup %1562 }
 0x5b1   : > { %v684_v62 = vmul.f32 %v1563_v61, %v1561_v57 }
 0x5b3   : > { %1435 = vmatmul.mubr.msk.f32.vlgmr.msra.gmra.mrb[6].mxu1 %vm424_vm3, %v684_v62 }
 0x5b4   : > { %1438 = vmatpush3.xpose.msk.msra.mxu1 %vm424_vm3, %v764_v59  ;;  %1439 = vmatprep.mubr.msk.f32.mxu1 %vm1639_vm2, %v1640_v5 }
 0x5b5   : > { %1442 = vmatprep.subr.mxu1 %v1640_v5 }
 0x5b7   : > { %1440 = vmatmul.mubr.msk.f32.vlgmr.msra.gmra.mrb[8].mxu1 %vm424_vm3, %v762_v63 }
 0x5b8   : > { %1444 = vmatprep.mubr.msk.f32.mxu1 %vm1639_vm2, %v1640_v5 }
 0x686   : > { %v757_v0 = vpop.f32.mrb[6].mxu1 }
 0x687   : > { %v1436_v1 = vpop.f32.mrb[7].mxu1 }
 0x68a   : > { %v835_v3 = vpop.f32.mrb[8].mxu1 }
 0x68b   : > { %v839_v6 = vmul.f32 0.35355338, %v835_v3  ;;  %v1441_v7 = vpop.f32.mrb[9].mxu1 }
 0x68c   : > { %v1228_v7 = vsub.s32 2, %v1118_v52 }
 0x68d   : > { %v840_v8 = vadd.f32 %v1843_v31, %v839_v6  ;;  %v1223_v6 = vsub.s32 1, %v1118_v52 }
 0x68f   : > { %v841_v9 = vsel %vm424_vm3, %v840_v8, -inf }
 0x690   : > { %842 = vmax.xlane.f32.xlu1 %v841_v9  ;;  %v1229_v9 = vrot.slane %v1116_v53, %v1228_v7 }
 0x6a1   : > { %852 = vrot.lane.b32.xlu1 %v1827_v26, %s1648_s14  ;;  %s1654_s14 = smov 24  }
 0x6a5   : > { %930 = vrot.lane.b32.xlu1 %v1827_v26, %s1649_s15 }
 0x6a9   : > { %928 = vrot.lane.b32.xlu1 %v1827_v26, %s1650_s16 }
 0x71d   : > { %v843_v10 = vpop.xlane.xlu1 %842 }
 0x71e   : > { %v844_v11 = vsub.f32 %v840_v8, %v843_v10 }
 0x720   : > { %v845_v12 = vmul.f32 1.442695, %v844_v11 }
 0x721   : > { %v853_v13 = vpop.permute.xlu1 %852 }
 0x722   : > { %1564 = vpow2.f32 %v845_v12  ;;  %1443 = vmatpush3.msra.mxu1 %v853_v13 }
 0x723   : > { %1447 = vmatprep.subr.mxu1 %v1640_v5 }
 0x725   : > { %v931_v18 = vpop.permute.xlu1 %930 }
 0x729   : > { %v929_v20 = vpop.permute.xlu1 %928 }
 0x72c   : > { %v1565_v14 = vpop.eup %1564 }
 0x72d   : > { %v847_v15 = vsel %vm424_vm3, %v1565_v14, 0.0 }
 0x72e   : > { %848 = vadd.xlane.f32.xlu0 %v847_v15 }
 0x7bb   : > { %v849_v16 = vpop.xlane.xlu0 %848 }
 0x7bc   : > { %1566 = vrcp.f32 %v849_v16 }
 0x7c6   : > { %v1567_v17 = vpop.eup %1566 }
 0x7c7   : > { %v851_v19 = vmul.f32 %v1567_v17, %v1565_v14 }
 0x7c9   : > { %1445 = vmatmul.mubr.msk.f32.vlgmr.msra.gmra.mrb[10].mxu1 %vm424_vm3, %v851_v19 }
 0x7ca   : > { %1448 = vmatpush3.xpose.msk.msra.mxu1 %vm424_vm3, %v931_v18  ;;  %1449 = vmatprep.mubr.msk.f32.mxu1 %vm1639_vm2, %v1640_v5 }
 0x7cb   : > { %1452 = vmatprep.subr.mxu1 %v1640_v5 }
 0x7cd   : > { %1450 = vmatmul.mubr.msk.f32.vlgmr.msra.gmra.mrb[12].mxu1 %vm424_vm3, %v929_v20 }
 0x7ce   : > { %1454 = vmatprep.mubr.msk.f32.mxu1 %vm1639_vm2, %v1640_v5 }
 0x89c   : > { %v924_v21 = vpop.f32.mrb[10].mxu1 }
 0x89d   : > { %v1446_v22 = vpop.f32.mrb[11].mxu1 }
 0x8a0   : > { %v1002_v24 = vpop.f32.mrb[12].mxu1 }
 0x8a1   : > { %v1006_v25 = vmul.f32 0.35355338, %v1002_v24  ;;  %v1451_v27 = vpop.f32.mrb[13].mxu1 }
 0x8a3   : > { %v1007_v28 = vadd.f32 %v1843_v31, %v1006_v25 }
 0x8a5   : > { %v1008_v29 = vsel %vm424_vm3, %v1007_v28, -inf }
 0x8a6   : > { %1009 = vmax.xlane.f32.xlu1 %v1008_v29 }
 0x933   : > { %v1010_v30 = vpop.xlane.xlu1 %1009 }
 0x934   : > { %v1011_v32 = vsub.f32 %v1007_v28, %v1010_v30 }
 0x936   : > { %v1012_v33 = vmul.f32 1.442695, %v1011_v32 }
 0x938   : > { %1568 = vpow2.f32 %v1012_v33 }
 0x942   : > { %v1569_v34 = vpop.eup %1568 }
 0x943   : > { %v1014_v35 = vsel %vm424_vm3, %v1569_v34, 0.0 }
 0x944   : > { %1015 = vadd.xlane.f32.xlu0 %v1014_v35 }
 0x95a   : > { %1019 = vrot.lane.b32.xlu0 %v1827_v26, %s1651_s17  ;;  %v1112_v26 = vld [vmem:[%s1976_s5] sm:$0xff]  ;;  %s278_s17 = sand.u32 1, %s1628_s25  }
 0x95b   : > { %v1493_v40 = vpack.c.bf16 %v1113_v39, %v1112_v26  ;;  %s1233_s9 = scalar_lea.sflag [#allocation3], %s278_s17 }
 0x95e   : > { %1096 = vrot.lane.b32.xlu0 %v757_v0, %s1652_s18  ;;  %s1318_s18 = sshll.u32 %s278_s17, 3 }
 0x95f   : > { %s280_s21 = scalar_lea.vmem [#allocation2], %s1318_s18 }
 0x960   : > { %s1246_s22 = sshll.u32 %s280_s21, 4  ;;  %s1930_s22 = int_to_ptr.vmem [resolvable:$true] %s1246_s22 }
 0x961   : > { %s1574_s19 = scalar_lea.vmem %s1930_s22, 128 }
 0x962   : > { %1100 = vrot.lane.b32.xlu0 %v924_v21, %s1653_s20  ;;  %s1353_s20 = sshll.u32 %s1717_s28, 7  ;;  %p1575_p11 = scmp.ne.s32.totalorder %s1930_s22, %s1574_s19 }
 0x963   : > { %s1928_s8 = scalar_lea.hbm %s1978_s7, %s1353_s20  ;;  %s1655_s28 = smov [#allocation2]  }
 0x964   : > { %p1576_p12 = pnand %p1575_p11, %p1734_p5  ;;  %s1578_s13 = sshll.u32 %s1655_s28, 4  ;;  %s1579_s13 = int_to_ptr.vmem [resolvable:$false] %s1578_s13 }
 0x965   : > { %p1581_p0 = scmp.lt.s32.totalorder %s1930_s22, %s1579_s13 }
 0x966   : > { %p1577_p13 = pneg %p1576_p12 }
 0x9d1   : > { %v1016_v36 = vpop.xlane.xlu0 %1015 }
 0x9d2   : > { %1570 = vrcp.f32 %v1016_v36 }
 0x9d5   : > { %v1020_v31 = vpop.permute.xlu0 %1019 }
 0x9d6   : > { %1453 = vmatpush3.msra.mxu1 %v1020_v31 }
 0x9d7   : > { %1492 = vmatprep.subr.bf16.mxu1 %v1638_v2 }
 0x9d9   : > { %v1097_v45 = vpop.permute.xlu0 %1096 }
 0x9dc   : > { %v1571_v37 = vpop.eup %1570 }
 0x9dd   : > { %v1018_v38 = vmul.f32 %v1571_v37, %v1569_v34  ;;  %v1101_v46 = vpop.permute.xlu0 %1100 }
 0x9df   : > { %1455 = vmatmul.mubr.msk.f32.vlgmr.msra.gmra.mrb[14].mxu1 %vm424_vm3, %v1018_v38 }
 0x9e0   : > { %1465 = vmatprep.mubr.msk.f32.mxu1 %vm1639_vm2, %v1640_v5  ;;  %1495 = vmatpush3.bf16.xpose.msk.msra.mxu1 %vm1753_vm1, %v1493_v40  ;;  %v1115_v5 = vld [vmem:[%s1976_s5 + $0x18] sm:$0xff] }
 0x9e1   : > { %1496 = vmatprep.subr.bf16.mxu1 %v1638_v2  ;;  %v1497_v42 = vpack.c.bf16 %v1115_v5, %v1114_v41  ;;  %v1107_v2 = vsel %vm424_vm3, %v1860_v47, %v1097_v45 }
 0x9e2   : > { %v1109_v48 = vsel %vm1108_vm4, %v1107_v2, %v1101_v46 }
 0x9e8   : > { %1499 = vmatpush3.bf16.xpose.msk.msra.mxu1 %vm1753_vm1, %v1497_v42 }
 0xab2   : > { %v1091_v43 = vpop.f32.mrb[14].mxu1 }
 0xab3   : > { %1104 = vrot.lane.b32.xlu1 %v1091_v43, %s1654_s14  ;;  %v1456_v44 = vpop.f32.mrb[15].mxu1  ;;  %s1580_s14 = scalar_lea.vmem %s1579_s13, 256 }
 0xab4   : > { %p1582_p1 = scmp.lt.s32.totalorder %s1580_s14, %s1574_s19 }
 0xab6   : > { %p1583_p2 = por %p1582_p1, %p1581_p0 }
 0xab8   : > { %p1584_p3 = pnand %p1583_p2, %p1577_p13 }
 0xb25   : > { %v1105_v49 = vpop.permute.xlu1 %1104 }
 0xb26   : > { %v1111_v50 = vsel %vm1110_vm5, %v1109_v48, %v1105_v49 }
 0xb27   : > { %1466 = vmatmul.mubr.msk.f32.vlgmr.msra.gmra.mrb[16].mxu1 %vm310_vm0, %v1111_v50 }
 0xbfa   : > { %v1202_v55 = vpop.f32.mrb[16].mxu1 }
 0xbfb   : > { %v1203_v56 = vadd.f32 %v1202_v55, %v1120_v54  ;;  %v1467_v57 = vpop.f32.mrb[17].mxu1 }
 0xbfd   : > { %v1206_v58 = vadd.f32 %v1203_v56, %v1820_v23  ;;  %v1224_v23 = vrot.slane %v1116_v53, %v1223_v6 }
 0xbff   : > { %v1207_v47 = vsel %vm310_vm0, %v1206_v58, 0.0 }
 0xc00   : > { %1208 = vadd.xlane.f32.xlu0 %v1207_v47 }
 0xc8d   : > { %v1209_v59 = vpop.xlane.xlu0 %1208 }
 0xc8e   : > { %v1211_v60 = vmul.f32 0.03125, %v1209_v59 }
 0xc90   : > { %v1212_v61 = vsub.f32 %v1206_v58, %v1211_v60 }
 0xc92   : > { %v1213_v62 = vmul.f32 %v1212_v61, %v1212_v61 }
 0xc94   : > { %v1214_v63 = vsel %vm310_vm0, %v1213_v62, 0.0 }
 0xc95   : > { %1215 = vadd.xlane.f32.xlu1 %v1214_v63 }
 0xd22   : > { %v1216_v0 = vpop.xlane.xlu1 %1215 }
 0xd23   : > { %v1217_v1 = vmul.f32 0.03125, %v1216_v0 }
 0xd25   : > { %v1218_v3 = vadd.f32 1e-12, %v1217_v1 }
 0xd27   : > { %1572 = vrsqrt.f32 %v1218_v3 }
 0xd31   : > { %v1573_v8 = vpop.eup %1572 }
 0xd32   : > { %v1220_v10 = vmul.f32 %v1573_v8, %v1212_v61 }
 0xd34   : > { %v1225_v11 = vmul.f32 %v1224_v23, %v1220_v10 }
 0xd36   : > { %v1230_v12 = vadd.f32 %v1229_v9, %v1225_v11 }
 0xd38   : > { %1231 = vst.msk [vmem:[%s280_s21] sm:$0xff] %vm310_vm0, %v1230_v12 }
 0xd39   : > { %1587 = shalt.err (!%p1584_p3)
}
 0xd3a   : > { %s1588_s15 = scalar_lea.hbm %s1928_s8, 128  ;;  %s1592_s18 = scalar_lea.hbm %s1978_s7, 256 }
 0xd3b   : > { %p1589_p4 = scmp.ne.s32.totalorder %s1928_s8, %s1588_s15  ;;  %p1593_p9 = scmp.lt.u32.totalorder %s1928_s8, %s1978_s7 }
 0xd3c   : > { %p1594_p10 = scmp.lt.u32.totalorder %s1592_s18, %s1588_s15  ;;  %p1596_p12 = scmp.lt.u32.totalorder %s1588_s15, %s1928_s8 }
 0xd3d   : > { %p1590_p7 = pnand %p1589_p4, %p1734_p5 }
 0xd3e   : > { %p1595_p11 = por %p1594_p10, %p1593_p9 }
 0xd3f   : > { %p1591_p8 = pneg %p1590_p7 }
 0xd40   : > { %p1597_p13 = por %p1596_p12, %p1595_p11 }
 0xd42   : > { %p1598_p0 = pnand %p1597_p13, %p1591_p8 }
 0xd44   : > { %1601 = shalt.err (!%p1598_p0)
}
 0xd45   : > { %1500 = dma.vmem_to_hbm [thread:$0]  (%p1734_p5), %s1930_s22, 128, %s1928_s8, %s1233_s9  }
 0xd46 PF: > { %p1506_p1 = scmp.ge.s32.totalorder %s1636_s27, 2  ;;  %s1258_s23 = sand.u32 1, %s1624_s24  }
 0xd47   : > { %s1259_s29 = scalar_lea.sflag [#allocation3], %s1258_s23 }
 0xd48   : > { %p1503_p2 = pnand %p1506_p1, %p1738_p6 }
 0xd4a   : > { %1619 = dma.done.wait (!%p1503_p2), %s1259_s29, 128  }
 0xd4b   : > { %1621 = vsyncadd (!%p1503_p2), %s1259_s29, 4294967168  ;;  %p17_p3 = scmp.ge.s32.totalorder %s1721_s30, 4   ;;  %s1983_s24 = smov %s1628_s25 }
 0xd4c   : > { %s1984_s25 = smov %s1632_s26  ;;  %s1985_s26 = smov %s1732_s10 }
 0xd4d   : > { %s1986_s27 = smov %s1721_s30  ;;  %19 = sbr.rel (!%p17_p3) target bundleno = 3 (0x3), region = 86 }
 0xd54   :  { %1264 = vsyncpa [#allocation3], 1 }
 0xd55   :  { %1266 = vsyncpa [#allocation3 + $0x1], 1 }

</bundles_post_ra>
